<compile_context>
chip_gen: v7x
topology: tpu7x:2x2x1
jax: 0.10.0
libtpu: 0.0.40
codegen_flags: <defaults>
</compile_context>

<pallas_src>
import jax
import jax.numpy as jnp
from jax.experimental import pallas as pl
from jax.experimental.pallas import tpu as pltpu

LANE = 128  # TPU lane width; output feature dim is padded to a multiple of this.


def dqn_kernel(x_ref, w1_ref, b1_ref, w2_ref, b2_ref, out_ref):
    # Fused: (x @ W1 + b1) -> ReLU -> (@ W2_padded + b2_padded)
    # Weights are bf16 (native MXU), accumulation is f32, bias/ReLU in f32.
    x = x_ref[...].astype(jnp.bfloat16)                               # [bB, In]
    h = jnp.dot(x, w1_ref[...],
                preferred_element_type=jnp.float32) + b1_ref[...]     # [bB, H] f32
    h = jnp.maximum(h, 0.0)                                           # ReLU (f32 VPU)
    y = jnp.dot(h.astype(jnp.bfloat16), w2_ref[...],
                preferred_element_type=jnp.float32) + b2_ref[...]     # [bB, OutPad] f32
    out_ref[...] = y.astype(out_ref.dtype)


def prepare_params(w1, b1, w2, b2, weight_dtype=jnp.bfloat16):
    """One-time conversion from PyTorch layout to kernel layout.

    w1: [H, In], b1: [H], w2: [Out, H], b2: [Out]   (nn.Linear convention)
    Returns (w1t, b1r, w2t_pad, b2_pad, out_size):
      w1t     [In, H]      bf16
      b1r     [1, H]       f32
      w2t_pad [H, OutPad]  bf16  (OutPad = max(128, ceil(Out/128)*128), extra cols 0)
      b2_pad  [1, OutPad]  f32   (extra cols 0)
    """
    w1 = jnp.asarray(w1, jnp.float32)
    b1 = jnp.asarray(b1, jnp.float32)
    w2 = jnp.asarray(w2, jnp.float32)
    b2 = jnp.asarray(b2, jnp.float32)

    out_size, hidden = w2.shape
    out_pad = max(LANE, pl.cdiv(out_size, LANE) * LANE)

    w1t = w1.T.astype(weight_dtype)                                  # [In, H]
    b1r = b1.reshape(1, -1)                                          # [1, H] f32
    w2t_pad = (jnp.zeros((hidden, out_pad), jnp.float32)
               .at[:, :out_size].set(w2.T)).astype(weight_dtype)     # [H, OutPad]
    b2_pad = jnp.zeros((1, out_pad), jnp.float32).at[:, :out_size].set(b2)
    return w1t, b1r, w2t_pad, b2_pad, out_size


def _num_tensorcores():
    """Heuristic TensorCore count per chip visible to one Pallas call."""
    try:
        kind = jax.devices()[0].device_kind.lower()
    except Exception:
        return 1
    # v4 and v7x expose 2 TensorCores (megacore); v5e/v6e expose 1.
    if "v7" in kind or "v4" in kind:
        return 2
    return 1


def _choose_block_b(B, block_b):
    """Fewest grid steps wins (fixed-overhead-bound kernel)."""
    if block_b is not None:
        return block_b if B % block_b == 0 else B
    cores = _num_tensorcores()
    if cores > 1 and B >= 256 and B % (8 * cores) == 0:
        # One tile per TensorCore on megacore parts.
        return B // cores
    # Single whole-batch step on single-TC parts (or awkward B).
    return B


def dqn_forward(x, params, *, block_b=None):
    """Fused DQN forward.

    x: [B, In] float32; params: output of prepare_params (call once, reuse).
    Returns the lane-dense padded output [B, OutPad] (f32); the valid Q-values
    are the first `out_size` columns, padded columns are exactly zero.
    """
    w1t, b1r, w2t_pad, b2_pad, _ = params
    B, in_size = x.shape
    hidden = w1t.shape[1]
    out_pad = w2t_pad.shape[1]

    block_b = _choose_block_b(B, block_b)
    grid = (B // block_b,)

    out_padded = pl.pallas_call(
        dqn_kernel,
        out_shape=jax.ShapeDtypeStruct((B, out_pad), jnp.float32),
        grid_spec=pltpu.PrefetchScalarGridSpec(
            num_scalar_prefetch=0,
            grid=grid,
            in_specs=[
                pl.BlockSpec((block_b, in_size), lambda i: (i, 0)),   # x tile
                pl.BlockSpec((in_size, hidden), lambda i: (0, 0)),    # W1 resident
                pl.BlockSpec((1, hidden), lambda i: (0, 0)),          # b1 resident
                pl.BlockSpec((hidden, out_pad), lambda i: (0, 0)),    # W2 resident
                pl.BlockSpec((1, out_pad), lambda i: (0, 0)),         # b2 resident
            ],
            out_specs=pl.BlockSpec((block_b, out_pad), lambda i: (i, 0)),
        ),
        compiler_params=pltpu.CompilerParams(
            dimension_semantics=("parallel",),
        ),
    )(x, w1t, b1r, w2t_pad, b2_pad)

    return out_padded


def init_params(key, input_size, hidden, output_size, dtype=jnp.float32):
    # Deterministic init mimicking PyTorch Linear default:
    # U(-1/sqrt(fan_in), +1/sqrt(fan_in)).
    k1, k2, k3, k4 = jax.random.split(key, 4)
    bound1 = 1.0 / (input_size ** 0.5)
    bound2 = 1.0 / (hidden ** 0.5)
    w1 = jax.random.uniform(k1, (hidden, input_size), dtype, -bound1, bound1)
    b1 = jax.random.uniform(k2, (hidden,), dtype, -bound1, bound1)
    w2 = jax.random.uniform(k3, (output_size, hidden), dtype, -bound2, bound2)
    b2 = jax.random.uniform(k4, (output_size,), dtype, -bound2, bound2)
    return w1, b1, w2, b2


if __name__ == "__main__":
    # CartPole-like shapes: state dim 4, 2 actions, hidden = 256 (as in module).
    # B = 256 exercises both grid configurations (1 step on v5e/v6e, 2 on v7x).
    B, INPUT_SIZE, HIDDEN, OUTPUT_SIZE = 256, 4, 256, 2

    key = jax.random.PRNGKey(0)
    kx, kp = jax.random.split(key)
    x = jax.random.normal(kx, (B, INPUT_SIZE), jnp.float32)
    w1, b1, w2, b2 = init_params(kp, INPUT_SIZE, HIDDEN, OUTPUT_SIZE)

    # One-time parameter preparation (transpose + bf16 cast + lane padding).
    params = prepare_params(w1, b1, w2, b2)
    out_size = params[-1]

    out_padded = dqn_forward(x, params)
    out_padded = jax.block_until_ready(out_padded)

    # Verification only: slice valid lanes and compare against a plain-JAX
    # f32 reference (bf16 weights => loosened tolerance).
    out = out_padded[:, :out_size]
    ref = jnp.maximum(x @ w1.T + b1, 0.0) @ w2.T + b2
    assert out_padded.shape == (B, LANE)
    assert out.shape == (B, OUTPUT_SIZE)
    assert jnp.all(out_padded[:, out_size:] == 0.0)          # padded lanes exactly zero
    assert jnp.allclose(out, ref, atol=3e-2, rtol=3e-2)

    print("KERNEL_OK")
</pallas_src>

<mosaic_0001>
module attributes {stable_mosaic.version = 11 : i64} {
  func.func @dqn_kernel(%arg0: i32, %arg1: memref<256x4xf32, #tpu.memory_space<vmem>>, %arg2: memref<4x256xbf16, #tpu.memory_space<vmem>>, %arg3: memref<1x256xf32, #tpu.memory_space<vmem>>, %arg4: memref<256x128xbf16, #tpu.memory_space<vmem>>, %arg5: memref<1x128xf32, #tpu.memory_space<vmem>>, %arg6: memref<256x128xf32, #tpu.memory_space<vmem>>) attributes {dimension_semantics = [#tpu.dimension_semantics<parallel>], iteration_bounds = array<i64: 1>, scalar_prefetch = 0 : i64, scratch_operands = 0 : i64, tpu.core_type = #tpu.core_type<tc>, window_params = [{transform_indices = @transform_0, window_bounds = array<i64: 256, 4>}, {pipeline_mode = #tpu.pipeline_mode<synchronous>, transform_indices = @transform_1, window_bounds = array<i64: 4, 256>}, {pipeline_mode = #tpu.pipeline_mode<synchronous>, transform_indices = @transform_2, window_bounds = array<i64: 1, 256>}, {pipeline_mode = #tpu.pipeline_mode<synchronous>, transform_indices = @transform_3, window_bounds = array<i64: 256, 128>}, {pipeline_mode = #tpu.pipeline_mode<synchronous>, transform_indices = @transform_4, window_bounds = array<i64: 1, 128>}, {transform_indices = @transform_5, window_bounds = array<i64: 256, 128>}]} {
    %c0 = arith.constant 0 : index
    %c0_0 = arith.constant 0 : index
    %0 = vector.load %arg1[%c0, %c0_0] : memref<256x4xf32, #tpu.memory_space<vmem>>, vector<256x4xf32>
    %1 = arith.truncf %0 : vector<256x4xf32> to vector<256x4xbf16>
    %c0_1 = arith.constant 0 : index
    %c0_2 = arith.constant 0 : index
    %2 = vector.load %arg2[%c0_1, %c0_2] : memref<4x256xbf16, #tpu.memory_space<vmem>>, vector<4x256xbf16>
    %cst = arith.constant dense<0.000000e+00> : vector<256x256xf32>
    %3 = tpu.matmul %1, %2, %cst {dimension_numbers = #tpu.dot_dimension_numbers<[1], [0], [0], [1], [0, 0, 1, 1], [], []>} : vector<256x4xbf16>, vector<4x256xbf16>, vector<256x256xf32> -> vector<256x256xf32>
    %c0_3 = arith.constant 0 : index
    %c0_4 = arith.constant 0 : index
    %4 = vector.load %arg3[%c0_3, %c0_4] : memref<1x256xf32, #tpu.memory_space<vmem>>, vector<1x256xf32>
    %5 = vector.broadcast %4 : vector<1x256xf32> to vector<256x256xf32>
    %6 = arith.addf %3, %5 : vector<256x256xf32>
    %cst_5 = arith.constant 0.000000e+00 : f32
    %7 = vector.broadcast %cst_5 : f32 to vector<256x256xf32>
    %8 = arith.maximumf %6, %7 : vector<256x256xf32>
    %9 = arith.truncf %8 : vector<256x256xf32> to vector<256x256xbf16>
    %c0_6 = arith.constant 0 : index
    %c0_7 = arith.constant 0 : index
    %10 = vector.load %arg4[%c0_6, %c0_7] : memref<256x128xbf16, #tpu.memory_space<vmem>>, vector<256x128xbf16>
    %cst_8 = arith.constant dense<0.000000e+00> : vector<256x128xf32>
    %11 = tpu.matmul %9, %10, %cst_8 {dimension_numbers = #tpu.dot_dimension_numbers<[1], [0], [0], [1], [0, 0, 1, 1], [], []>} : vector<256x256xbf16>, vector<256x128xbf16>, vector<256x128xf32> -> vector<256x128xf32>
    %c0_9 = arith.constant 0 : index
    %c0_10 = arith.constant 0 : index
    %12 = vector.load %arg5[%c0_9, %c0_10] : memref<1x128xf32, #tpu.memory_space<vmem>>, vector<1x128xf32>
    %13 = vector.broadcast %12 : vector<1x128xf32> to vector<256x128xf32>
    %14 = arith.addf %11, %13 : vector<256x128xf32>
    %c0_11 = arith.constant 0 : index
    %c0_12 = arith.constant 0 : index
    %15 = vector.load %arg6[%c0_11, %c0_12] : memref<256x128xf32, #tpu.memory_space<vmem>>, vector<256x128xf32>
    tpu.vector_store %arg6[%c0_11, %c0_12], %14 {strides = array<i32>} : memref<256x128xf32, #tpu.memory_space<vmem>>, vector<256x128xf32>,
    return
  }
  func.func @transform_0(%arg0: i32) -> (i32, i32) {
    %c0_i32 = arith.constant 0 : i32
    %c0_i32_0 = arith.constant 0 : i32
    return %arg0, %c0_i32 : i32, i32
  }
  func.func @transform_1(%arg0: i32) -> (i32, i32) {
    %c0_i32 = arith.constant 0 : i32
    %c0_i32_0 = arith.constant 0 : i32
    %c0_i32_1 = arith.constant 0 : i32
    return %c0_i32, %c0_i32_0 : i32, i32
  }
  func.func @transform_2(%arg0: i32) -> (i32, i32) {
    %c0_i32 = arith.constant 0 : i32
    %c0_i32_0 = arith.constant 0 : i32
    %c0_i32_1 = arith.constant 0 : i32
    return %c0_i32, %c0_i32_0 : i32, i32
  }
  func.func @transform_3(%arg0: i32) -> (i32, i32) {
    %c0_i32 = arith.constant 0 : i32
    %c0_i32_0 = arith.constant 0 : i32
    %c0_i32_1 = arith.constant 0 : i32
    return %c0_i32, %c0_i32_0 : i32, i32
  }
  func.func @transform_4(%arg0: i32) -> (i32, i32) {
    %c0_i32 = arith.constant 0 : i32
    %c0_i32_0 = arith.constant 0 : i32
    %c0_i32_1 = arith.constant 0 : i32
    return %c0_i32, %c0_i32_0 : i32, i32
  }
  func.func @transform_5(%arg0: i32) -> (i32, i32) {
    %c0_i32 = arith.constant 0 : i32
    %c0_i32_0 = arith.constant 0 : i32
    return %arg0, %c0_i32 : i32, i32
  }
}

</mosaic_0001>

<bundles_post_ra>
// kernel: tpu_custom_call.1
= control target key start
LH: loop header
LB: loop body
LE: loop exit
PB: predicated region body
PF: predicated region fallthrough
CT: control target
= control target key end

     0   :  { %vm141_vm0 = vcmask 1041408   ;;  %v988_v3 = vmov 0   ;;  %vm92_vm1 = vcmask 31744   ;;  %s1321_s0 = inlined_call_operand.vmem [shape: f32[256,4], index: 0, kind: input, shape index: {}]   ;;  %s1322_s1 = inlined_call_operand.vmem [shape: bf16[4,256], index: 1, kind: input, shape index: {}]   ;;  %s1323_s2 = inlined_call_operand.vmem [shape: f32[1,256], index: 2, kind: input, shape index: {}]   ;;  %s1324_s3 = inlined_call_operand.vmem [shape: bf16[256,128], index: 3, kind: input, shape index: {}]   ;;  %s1325_s4 = inlined_call_operand.vmem [shape: f32[1,128], index: 4, kind: input, shape index: {}]   ;;  %s1326_s5 = inlined_call_operand.hbm [shape: f32[256,128], index: 5, kind: output, shape index: {}]  }
   0x1   :  { %v781_v0 = vld.sshfl [vmem:[%s1322_s1] sm:$0x33 pattern:$0x76325410]  ;;  %180 = vmatprep.mubr.bf16.mxu0 %v988_v3  ;;  %v23_v5 = vld [vmem:[%s1321_s0 + $0x8] sm:$0xff]  ;;  %v24_v7 = vld [vmem:[%s1321_s0 + $0x10] sm:$0xff] }
   0x2   :  { %v91_v1 = vcombine.high %v781_v0, %v781_v0  ;;  %v143_v2 = vsel %vm141_vm0, %v781_v0, 0  ;;  %v22_v4 = vld [vmem:[%s1321_s0] sm:$0xff]  ;;  %v25_v8 = vld [vmem:[%s1321_s0 + $0x18] sm:$0xff]  ;;  %v950_v13 = vld [vmem:[%s1324_s3 + $0x48] sm:$0xff]  }
   0x3   :  { %v54_v6 = vpack.c.bf16 %v23_v5, %v22_v4  ;;  %v55_v9 = vpack.c.bf16 %v25_v8, %v24_v7  ;;  %v948_v10 = vld [vmem:[%s1324_s3 + $0x40] sm:$0xff]   ;;  %v27_v14 = vld [vmem:[%s1321_s0 + $0x28] sm:$0xff]  ;;  %v952_v16 = vld [vmem:[%s1324_s3 + $0x50] sm:$0xff]  }
   0x4   :  { %782 = vmatprep.subr.msk.bf16.mxu0 %vm141_vm0, %v91_v1  ;;  %v949_v11 = vld [vmem:[%s1324_s3] sm:$0xff]   ;;  %928 = vmatprep.subr.bf16.mxu1 %v948_v10  ;;  %v951_v15 = vld [vmem:[%s1324_s3 + $0x8] sm:$0xff]   ;;  %v953_v18 = vld [vmem:[%s1324_s3 + $0x10] sm:$0xff]  }
   0x5   :  { %149 = vmatpush1.bf16.msra.mxu0 %v143_v2  ;;  %v26_v12 = vld [vmem:[%s1321_s0 + $0x20] sm:$0xff]  ;;  %936 = vmatpush3.bf16.msra.mxu1 %v949_v11  ;;  %v954_v19 = vld [vmem:[%s1324_s3 + $0x58] sm:$0xff]   ;;  %v28_v20 = vld [vmem:[%s1321_s0 + $0x30] sm:$0xff] }
   0x6   :  { %816 = vmatprep.subr.bf16.mxu0 %v948_v10  ;;  %929 = vmatprep.subr.bf16.mxu1 %v950_v13  ;;  %v56_v17 = vpack.c.bf16 %v27_v14, %v26_v12  ;;  %v29_v21 = vld [vmem:[%s1321_s0 + $0x38] sm:$0xff]  ;;  %v956_v23 = vld [vmem:[%s1324_s3 + $0x60] sm:$0xff]  }
   0x7   :  { %v955_v22 = vld [vmem:[%s1324_s3 + $0x18] sm:$0xff]  }
   0x8   :  { %783 = vmatmul.mubr.msk.bf16.vlgmr.msra.gmra.mrb[0].mxu0 %vm92_vm1, %v54_v6 }
   0x9   :  { %190 = vmatprep.mubr.bf16.mxu0 %v988_v3  ;;  %817 = vmatpush3.bf16.msra.mxu0 %v949_v11 }
   0xa   :  { %818 = vmatprep.subr.bf16.mxu0 %v950_v13  ;;  %937 = vmatpush3.bf16.msra.mxu1 %v951_v15 }
   0xb   :  { %930 = vmatprep.subr.bf16.mxu1 %v952_v16 }
   0xd   :  { %819 = vmatpush3.bf16.msra.mxu0 %v951_v15 }
   0xe   :  { %820 = vmatprep.subr.bf16.mxu0 %v952_v16  ;;  %938 = vmatpush3.bf16.msra.mxu1 %v953_v18 }
   0xf   :  { %931 = vmatprep.subr.bf16.mxu1 %v954_v19 }
  0x10   :  { %784 = vmatmul.mubr.msk.bf16.gmra.mrb[4].mxu0 %vm92_vm1, %v55_v9 }
  0x11   :  { %200 = vmatprep.mubr.bf16.mxu0 %v988_v3  ;;  %821 = vmatpush3.bf16.msra.mxu0 %v953_v18 }
  0x12   :  { %822 = vmatprep.subr.bf16.mxu0 %v954_v19 }
  0x18   :  { %785 = vmatmul.mubr.msk.bf16.gmra.mrb[8].mxu0 %vm92_vm1, %v56_v17 }
  0x19   :  { %210 = vmatprep.mubr.bf16.mxu0 %v988_v3 }
  0x1a   :  { %10 = vsyncpa [#allocation3], 0  ;;  %v57_v24 = vpack.c.bf16 %v29_v21, %v28_v20  ;;  %939 = vmatpush3.bf16.msra.mxu1 %v955_v22  ;;  %823 = vmatpush3.bf16.msra.mxu0 %v955_v22  ;;  %v957_v25 = vld [vmem:[%s1324_s3 + $0x20] sm:$0xff]   ;;  %v958_v26 = vld [vmem:[%s1324_s3 + $0x68] sm:$0xff]   ;;  %v73_v5 = vlaneseq }
  0x1b   :  { %932 = vmatprep.subr.bf16.mxu1 %v956_v23  ;;  %824 = vmatprep.subr.bf16.mxu0 %v956_v23  ;;  %v30_v27 = vld [vmem:[%s1321_s0 + $0x40] sm:$0xff]  ;;  %v31_v28 = vld [vmem:[%s1321_s0 + $0x48] sm:$0xff]  ;;  %v32_v30 = vld [vmem:[%s1321_s0 + $0x50] sm:$0xff] }
  0x1c   :  { %v58_v29 = vpack.c.bf16 %v31_v28, %v30_v27  ;;  %v33_v31 = vld [vmem:[%s1321_s0 + $0x58] sm:$0xff]  ;;  %v34_v33 = vld [vmem:[%s1321_s0 + $0x60] sm:$0xff]  ;;  %v35_v34 = vld [vmem:[%s1321_s0 + $0x68] sm:$0xff]  ;;  %v74_v6 = vshrl.u32 %v73_v5, 7 }
  0x1d   :  { %v59_v32 = vpack.c.bf16 %v33_v31, %v32_v30  ;;  %v60_v35 = vpack.c.bf16 %v35_v34, %v34_v33  ;;  %v36_v36 = vld [vmem:[%s1321_s0 + $0x70] sm:$0xff]  ;;  %v37_v37 = vld [vmem:[%s1321_s0 + $0x78] sm:$0xff]  ;;  %v38_v39 = vld [vmem:[%s1321_s0 + $0x80] sm:$0xff] }
  0x1e   :  { %940 = vmatpush3.bf16.msra.mxu1 %v957_v25  ;;  %825 = vmatpush3.bf16.msra.mxu0 %v957_v25  ;;  %v61_v38 = vpack.c.bf16 %v37_v37, %v36_v36  ;;  %v39_v40 = vld [vmem:[%s1321_s0 + $0x88] sm:$0xff]  ;;  %v40_v42 = vld [vmem:[%s1321_s0 + $0x90] sm:$0xff]  ;;  %v41_v43 = vld [vmem:[%s1321_s0 + $0x98] sm:$0xff]  ;;  %v75_v7 = vsub.s32 0, %v74_v6  ;;  %v79_v9 = vsub.s32 1, %v74_v6 }
  0x1f   :  { %826 = vmatprep.subr.bf16.mxu0 %v958_v26  ;;  %933 = vmatprep.subr.bf16.mxu1 %v958_v26  ;;  %v62_v41 = vpack.c.bf16 %v39_v40, %v38_v39  ;;  %v63_v44 = vpack.c.bf16 %v41_v43, %v40_v42  ;;  %v42_v45 = vld [vmem:[%s1321_s0 + $0xa0] sm:$0xff]  ;;  %v43_v46 = vld [vmem:[%s1321_s0 + $0xa8] sm:$0xff]  ;;  %v44_v48 = vld [vmem:[%s1321_s0 + $0xb0] sm:$0xff] }
  0x20   :  { %786 = vmatmul.mubr.msk.bf16.gmra.mrb[12].mxu0 %vm92_vm1, %v57_v24  ;;  %v64_v47 = vpack.c.bf16 %v43_v46, %v42_v45  ;;  %v45_v49 = vld [vmem:[%s1321_s0 + $0xb8] sm:$0xff]  ;;  %v959_v50 = vld [vmem:[%s1324_s3 + $0x28] sm:$0xff]   ;;  %v960_v52 = vld [vmem:[%s1324_s3 + $0x70] sm:$0xff]  }
  0x21   :  { %220 = vmatprep.mubr.bf16.mxu0 %v988_v3  ;;  %v65_v51 = vpack.c.bf16 %v45_v49, %v44_v48  ;;  %v961_v53 = vld [vmem:[%s1324_s3 + $0x30] sm:$0xff]   ;;  %v962_v54 = vld [vmem:[%s1324_s3 + $0x78] sm:$0xff]   ;;  %v46_v55 = vld [vmem:[%s1321_s0 + $0xc0] sm:$0xff] }
  0x22   :  { %827 = vmatpush3.bf16.msra.mxu0 %v959_v50  ;;  %941 = vmatpush3.bf16.msra.mxu1 %v959_v50  ;;  %v47_v56 = vld [vmem:[%s1321_s0 + $0xc8] sm:$0xff]  ;;  %v963_v57 = vld [vmem:[%s1324_s3 + $0x38] sm:$0xff]   ;;  %v48_v59 = vld [vmem:[%s1321_s0 + $0xd0] sm:$0xff] }
  0x23   :  { %828 = vmatprep.subr.bf16.mxu0 %v960_v52  ;;  %934 = vmatprep.subr.bf16.mxu1 %v960_v52  ;;  %v66_v58 = vpack.c.bf16 %v47_v56, %v46_v55  ;;  %v49_v60 = vld [vmem:[%s1321_s0 + $0xd8] sm:$0xff]  ;;  %v50_v62 = vld [vmem:[%s1321_s0 + $0xe0] sm:$0xff]  ;;  %v51_v63 = vld [vmem:[%s1321_s0 + $0xe8] sm:$0xff] }
  0x24   :  { %v67_v61 = vpack.c.bf16 %v49_v60, %v48_v59  ;;  %v68_v0 = vpack.c.bf16 %v51_v63, %v50_v62  ;;  %v52_v1 = vld [vmem:[%s1321_s0 + $0xf0] sm:$0xff]  ;;  %v53_v2 = vld [vmem:[%s1321_s0 + $0xf8] sm:$0xff]  ;;  %v71_v8 = vld [vmem:[%s1323_s2] sm:$0x3] }
  0x25   :  { %v69_v4 = vpack.c.bf16 %v53_v2, %v52_v1  ;;  %v1206_v10 = vrot.slane %v71_v8, %v79_v9 }
  0x26   :  { %829 = vmatpush3.bf16.msra.mxu0 %v961_v53  ;;  %942 = vmatpush3.bf16.msra.mxu1 %v961_v53 }
  0x27   :  { %830 = vmatprep.subr.bf16.mxu0 %v962_v54  ;;  %935 = vmatprep.subr.bf16.mxu1 %v962_v54 }
  0x28   :  { %787 = vmatmul.mubr.msk.bf16.gmra.mrb[16].mxu0 %vm92_vm1, %v58_v29 }
  0x29   :  { %230 = vmatprep.mubr.bf16.mxu0 %v988_v3 }
  0x2a   :  { %831 = vmatpush3.bf16.msra.mxu0 %v963_v57  ;;  %943 = vmatpush3.bf16.msra.mxu1 %v963_v57 }
  0x30   :  { %788 = vmatmul.mubr.msk.bf16.gmra.mrb[20].mxu0 %vm92_vm1, %v59_v32 }
  0x31   :  { %240 = vmatprep.mubr.bf16.mxu0 %v988_v3 }
  0x38   :  { %789 = vmatmul.mubr.msk.bf16.gmra.mrb[24].mxu0 %vm92_vm1, %v60_v35 }
  0x39   :  { %250 = vmatprep.mubr.bf16.mxu0 %v988_v3 }
  0x40   :  { %790 = vmatmul.mubr.msk.bf16.gmra.mrb[28].mxu0 %vm92_vm1, %v61_v38 }
  0x41   :  { %260 = vmatprep.mubr.bf16.mxu0 %v988_v3 }
  0x48   :  { %791 = vmatmul.mubr.msk.bf16.gmra.mrb[32].mxu0 %vm92_vm1, %v62_v41 }
  0x49   :  { %270 = vmatprep.mubr.bf16.mxu0 %v988_v3 }
  0x50   :  { %792 = vmatmul.mubr.msk.bf16.gmra.mrb[36].mxu0 %vm92_vm1, %v63_v44 }
  0x51   :  { %280 = vmatprep.mubr.bf16.mxu0 %v988_v3 }
  0x58   :  { %793 = vmatmul.mubr.msk.bf16.gmra.mrb[40].mxu0 %vm92_vm1, %v64_v47 }
  0x59   :  { %290 = vmatprep.mubr.bf16.mxu0 %v988_v3 }
  0x60   :  { %794 = vmatmul.mubr.msk.bf16.gmra.mrb[44].mxu0 %vm92_vm1, %v65_v51 }
  0x61   :  { %300 = vmatprep.mubr.bf16.mxu0 %v988_v3 }
  0x68   :  { %795 = vmatmul.mubr.msk.bf16.gmra.mrb[48].mxu0 %vm92_vm1, %v66_v58 }
  0x69   :  { %310 = vmatprep.mubr.bf16.mxu0 %v988_v3 }
  0x70   :  { %796 = vmatmul.mubr.msk.bf16.gmra.mrb[52].mxu0 %vm92_vm1, %v67_v61 }
  0x71   :  { %320 = vmatprep.mubr.bf16.mxu0 %v988_v3 }
  0x78   :  { %797 = vmatmul.mubr.msk.bf16.gmra.mrb[56].mxu0 %vm92_vm1, %v68_v0 }
  0x79   :  { %330 = vmatprep.mubr.bf16.mxu0 %v988_v3  ;;  %v1204_v3 = vrot.slane %v71_v8, %v75_v7 }
  0x80   :  { %798 = vmatmul.mubr.msk.bf16.gmra.mrb[60].mxu0 %vm92_vm1, %v69_v4 }
  0xdb   :  { %v182_v11 = vpop.f32.mrb[0].mxu0 }
  0xdc   :  { %v183_v12 = vadd.f32 %v182_v11, %v1204_v3  ;;  %v184_v13 = vpop.f32.mrb[1].mxu0 }
  0xdd   :  { %v185_v14 = vadd.f32 %v184_v13, %v1206_v10  ;;  %v186_v15 = vpop.f32.mrb[2].mxu0 }
  0xde   :  { %v187_v16 = vadd.f32 %v186_v15, %v1204_v3  ;;  %v188_v17 = vpop.f32.mrb[3].mxu0  ;;  %v341_v19 = vmax.f32 %v183_v12, 0.0 }
  0xdf   :  { %v189_v18 = vadd.f32 %v188_v17, %v1206_v10  ;;  %v342_v21 = vmax.f32 %v185_v14, 0.0 }
  0xe0   :  { %v343_v20 = vmax.f32 %v187_v16, 0.0 }
  0xe1   :  { %v344_v22 = vmax.f32 %v189_v18, 0.0 }
  0xe2   :  { %v405_v23 = vpack.c.bf16 %v343_v20, %v341_v19 }
  0xe3   :  { %v406_v24 = vpack.c.bf16 %v344_v22, %v342_v21  ;;  %v192_v25 = vpop.f32.mrb[4].mxu0 }
  0xe4   :  { %v193_v26 = vadd.f32 %v192_v25, %v1204_v3  ;;  %v194_v27 = vpop.f32.mrb[5].mxu0 }
  0xe5   :  { %v195_v28 = vadd.f32 %v194_v27, %v1206_v10  ;;  %v196_v29 = vpop.f32.mrb[6].mxu0  ;;  %604 = vmatprep.mubr.bf16.mxu0 %v406_v24 }
  0xe6   :  { %v197_v30 = vadd.f32 %v196_v29, %v1204_v3  ;;  %v198_v31 = vpop.f32.mrb[7].mxu0  ;;  %605 = vmatmul.mubr.bf16.vlgmr.msra.gmra.mrb[64].mxu0 %v405_v23  ;;  %v345_v33 = vmax.f32 %v193_v26, 0.0 }
  0xe7   :  { %v199_v32 = vadd.f32 %v198_v31, %v1206_v10  ;;  %v346_v35 = vmax.f32 %v195_v28, 0.0 }
  0xe8   :  { %v347_v34 = vmax.f32 %v197_v30, 0.0 }
  0xe9   :  { %v348_v36 = vmax.f32 %v199_v32, 0.0 }
  0xea   :  { %v407_v37 = vpack.c.bf16 %v347_v34, %v345_v33 }
  0xeb   :  { %v202_v38 = vpop.f32.mrb[8].mxu0  ;;  %v408_v39 = vpack.c.bf16 %v348_v36, %v346_v35 }
  0xec   :  { %v203_v40 = vadd.f32 %v202_v38, %v1204_v3  ;;  %v204_v41 = vpop.f32.mrb[9].mxu0 }
  0xed   :  { %v205_v42 = vadd.f32 %v204_v41, %v1206_v10  ;;  %v206_v43 = vpop.f32.mrb[10].mxu0  ;;  %612 = vmatprep.mubr.bf16.mxu1 %v408_v39 }
  0xee   :  { %v207_v44 = vadd.f32 %v206_v43, %v1204_v3  ;;  %v208_v45 = vpop.f32.mrb[11].mxu0  ;;  %613 = vmatmul.mubr.bf16.vlgmr.msra.gmra.mrb[0].mxu1 %v407_v37  ;;  %v349_v47 = vmax.f32 %v203_v40, 0.0 }
  0xef   :  { %v209_v46 = vadd.f32 %v208_v45, %v1206_v10  ;;  %v350_v49 = vmax.f32 %v205_v42, 0.0 }
  0xf0   :  { %v351_v48 = vmax.f32 %v207_v44, 0.0 }
  0xf1   :  { %v352_v50 = vmax.f32 %v209_v46, 0.0 }
  0xf2   :  { %v409_v51 = vpack.c.bf16 %v351_v48, %v349_v47 }
  0xf3   :  { %v410_v52 = vpack.c.bf16 %v352_v50, %v350_v49  ;;  %v212_v53 = vpop.f32.mrb[12].mxu0 }
  0xf4   :  { %v213_v54 = vadd.f32 %v212_v53, %v1204_v3  ;;  %v214_v55 = vpop.f32.mrb[13].mxu0 }
  0xf5   :  { %v215_v56 = vadd.f32 %v214_v55, %v1206_v10  ;;  %v216_v57 = vpop.f32.mrb[14].mxu0  ;;  %620 = vmatprep.mubr.bf16.mxu1 %v410_v52 }
  0xf6   :  { %v217_v58 = vadd.f32 %v216_v57, %v1204_v3  ;;  %v218_v59 = vpop.f32.mrb[15].mxu0  ;;  %621 = vmatmul.mubr.bf16.gmra.mrb[4].mxu1 %v409_v51  ;;  %v353_v61 = vmax.f32 %v213_v54, 0.0 }
  0xf7   :  { %v219_v60 = vadd.f32 %v218_v59, %v1206_v10  ;;  %v354_v63 = vmax.f32 %v215_v56, 0.0 }
  0xf8   :  { %v355_v62 = vmax.f32 %v217_v58, 0.0 }
  0xf9   :  { %v356_v0 = vmax.f32 %v219_v60, 0.0 }
  0xfa   :  { %v411_v1 = vpack.c.bf16 %v355_v62, %v353_v61 }
  0xfb   :  { %v412_v2 = vpack.c.bf16 %v356_v0, %v354_v63  ;;  %v222_v4 = vpop.f32.mrb[16].mxu0 }
  0xfc   :  { %v223_v5 = vadd.f32 %v222_v4, %v1204_v3  ;;  %v224_v6 = vpop.f32.mrb[17].mxu0 }
  0xfd   :  { %v225_v7 = vadd.f32 %v224_v6, %v1206_v10  ;;  %v226_v8 = vpop.f32.mrb[18].mxu0  ;;  %628 = vmatprep.mubr.bf16.mxu1 %v412_v2 }
  0xfe   :  { %v227_v9 = vadd.f32 %v226_v8, %v1204_v3  ;;  %v228_v11 = vpop.f32.mrb[19].mxu0  ;;  %629 = vmatmul.mubr.bf16.gmra.mrb[8].mxu1 %v411_v1  ;;  %v357_v13 = vmax.f32 %v223_v5, 0.0 }
  0xff   :  { %v229_v12 = vadd.f32 %v228_v11, %v1206_v10  ;;  %v358_v15 = vmax.f32 %v225_v7, 0.0 }
 0x100   :  { %v359_v14 = vmax.f32 %v227_v9, 0.0 }
 0x101   :  { %v360_v16 = vmax.f32 %v229_v12, 0.0 }
 0x102   :  { %v413_v17 = vpack.c.bf16 %v359_v14, %v357_v13 }
 0x103   :  { %v414_v18 = vpack.c.bf16 %v360_v16, %v358_v15  ;;  %v232_v19 = vpop.f32.mrb[20].mxu0 }
 0x104   :  { %v233_v20 = vadd.f32 %v232_v19, %v1204_v3  ;;  %v234_v21 = vpop.f32.mrb[21].mxu0 }
 0x105   :  { %v235_v22 = vadd.f32 %v234_v21, %v1206_v10  ;;  %v236_v23 = vpop.f32.mrb[22].mxu0  ;;  %636 = vmatprep.mubr.bf16.mxu1 %v414_v18 }
 0x106   :  { %v237_v24 = vadd.f32 %v236_v23, %v1204_v3  ;;  %v238_v25 = vpop.f32.mrb[23].mxu0  ;;  %637 = vmatmul.mubr.bf16.gmra.mrb[12].mxu1 %v413_v17  ;;  %v361_v27 = vmax.f32 %v233_v20, 0.0 }
 0x107   :  { %v239_v26 = vadd.f32 %v238_v25, %v1206_v10  ;;  %v362_v29 = vmax.f32 %v235_v22, 0.0 }
 0x108   :  { %v363_v28 = vmax.f32 %v237_v24, 0.0 }
 0x109   :  { %v364_v30 = vmax.f32 %v239_v26, 0.0 }
 0x10a   :  { %v415_v31 = vpack.c.bf16 %v363_v28, %v361_v27 }
 0x10b   :  { %v416_v32 = vpack.c.bf16 %v364_v30, %v362_v29  ;;  %v242_v33 = vpop.f32.mrb[24].mxu0 }
 0x10c   :  { %v243_v34 = vadd.f32 %v242_v33, %v1204_v3  ;;  %v244_v35 = vpop.f32.mrb[25].mxu0 }
 0x10d   :  { %v245_v36 = vadd.f32 %v244_v35, %v1206_v10  ;;  %v246_v37 = vpop.f32.mrb[26].mxu0  ;;  %644 = vmatprep.mubr.bf16.mxu1 %v416_v32 }
 0x10e   :  { %v247_v38 = vadd.f32 %v246_v37, %v1204_v3  ;;  %v248_v39 = vpop.f32.mrb[27].mxu0  ;;  %645 = vmatmul.mubr.bf16.gmra.mrb[16].mxu1 %v415_v31  ;;  %v365_v41 = vmax.f32 %v243_v34, 0.0 }
 0x10f   :  { %v249_v40 = vadd.f32 %v248_v39, %v1206_v10  ;;  %v366_v43 = vmax.f32 %v245_v36, 0.0 }
 0x110   :  { %v367_v42 = vmax.f32 %v247_v38, 0.0 }
 0x111   :  { %v368_v44 = vmax.f32 %v249_v40, 0.0 }
 0x112   :  { %v417_v45 = vpack.c.bf16 %v367_v42, %v365_v41 }
 0x113   :  { %v418_v46 = vpack.c.bf16 %v368_v44, %v366_v43  ;;  %v252_v47 = vpop.f32.mrb[28].mxu0 }
 0x114   :  { %v253_v48 = vadd.f32 %v252_v47, %v1204_v3  ;;  %v254_v49 = vpop.f32.mrb[29].mxu0 }
 0x115   :  { %v255_v50 = vadd.f32 %v254_v49, %v1206_v10  ;;  %v256_v51 = vpop.f32.mrb[30].mxu0  ;;  %652 = vmatprep.mubr.bf16.mxu1 %v418_v46 }
 0x116   :  { %v257_v52 = vadd.f32 %v256_v51, %v1204_v3  ;;  %v258_v53 = vpop.f32.mrb[31].mxu0  ;;  %653 = vmatmul.mubr.bf16.gmra.mrb[20].mxu1 %v417_v45  ;;  %v369_v55 = vmax.f32 %v253_v48, 0.0 }
 0x117   :  { %v259_v54 = vadd.f32 %v258_v53, %v1206_v10  ;;  %v370_v57 = vmax.f32 %v255_v50, 0.0 }
 0x118   :  { %v371_v56 = vmax.f32 %v257_v52, 0.0 }
 0x119   :  { %v372_v58 = vmax.f32 %v259_v54, 0.0 }
 0x11a   :  { %v419_v59 = vpack.c.bf16 %v371_v56, %v369_v55 }
 0x11b   :  { %v420_v60 = vpack.c.bf16 %v372_v58, %v370_v57  ;;  %v262_v61 = vpop.f32.mrb[32].mxu0 }
 0x11c   :  { %v263_v62 = vadd.f32 %v262_v61, %v1204_v3  ;;  %v264_v63 = vpop.f32.mrb[33].mxu0 }
 0x11d   :  { %v265_v0 = vadd.f32 %v264_v63, %v1206_v10  ;;  %v266_v1 = vpop.f32.mrb[34].mxu0  ;;  %660 = vmatprep.mubr.bf16.mxu1 %v420_v60 }
 0x11e   :  { %v267_v2 = vadd.f32 %v266_v1, %v1204_v3  ;;  %v268_v4 = vpop.f32.mrb[35].mxu0  ;;  %661 = vmatmul.mubr.bf16.gmra.mrb[24].mxu1 %v419_v59  ;;  %v373_v6 = vmax.f32 %v263_v62, 0.0 }
 0x11f   :  { %v269_v5 = vadd.f32 %v268_v4, %v1206_v10  ;;  %v374_v8 = vmax.f32 %v265_v0, 0.0 }
 0x120   :  { %v375_v7 = vmax.f32 %v267_v2, 0.0 }
 0x121   :  { %v376_v9 = vmax.f32 %v269_v5, 0.0 }
 0x122   :  { %v421_v11 = vpack.c.bf16 %v375_v7, %v373_v6 }
 0x123   :  { %v422_v12 = vpack.c.bf16 %v376_v9, %v374_v8  ;;  %v272_v13 = vpop.f32.mrb[36].mxu0 }
 0x124   :  { %v273_v14 = vadd.f32 %v272_v13, %v1204_v3  ;;  %v274_v15 = vpop.f32.mrb[37].mxu0 }
 0x125   :  { %v275_v16 = vadd.f32 %v274_v15, %v1206_v10  ;;  %v276_v17 = vpop.f32.mrb[38].mxu0  ;;  %668 = vmatprep.mubr.bf16.mxu1 %v422_v12 }
 0x126   :  { %v277_v18 = vadd.f32 %v276_v17, %v1204_v3  ;;  %v278_v19 = vpop.f32.mrb[39].mxu0  ;;  %669 = vmatmul.mubr.bf16.gmra.mrb[28].mxu1 %v421_v11  ;;  %v377_v21 = vmax.f32 %v273_v14, 0.0 }
 0x127   :  { %v279_v20 = vadd.f32 %v278_v19, %v1206_v10  ;;  %v378_v23 = vmax.f32 %v275_v16, 0.0 }
 0x128   :  { %v379_v22 = vmax.f32 %v277_v18, 0.0 }
 0x129   :  { %v380_v24 = vmax.f32 %v279_v20, 0.0 }
 0x12a   :  { %v423_v25 = vpack.c.bf16 %v379_v22, %v377_v21 }
 0x12b   :  { %v424_v26 = vpack.c.bf16 %v380_v24, %v378_v23  ;;  %v282_v27 = vpop.f32.mrb[40].mxu0 }
 0x12c   :  { %v283_v28 = vadd.f32 %v282_v27, %v1204_v3  ;;  %v284_v29 = vpop.f32.mrb[41].mxu0 }
 0x12d   :  { %v285_v30 = vadd.f32 %v284_v29, %v1206_v10  ;;  %v286_v31 = vpop.f32.mrb[42].mxu0  ;;  %676 = vmatprep.mubr.bf16.mxu1 %v424_v26 }
 0x12e   :  { %v287_v32 = vadd.f32 %v286_v31, %v1204_v3  ;;  %v288_v33 = vpop.f32.mrb[43].mxu0  ;;  %677 = vmatmul.mubr.bf16.gmra.mrb[32].mxu1 %v423_v25  ;;  %v381_v35 = vmax.f32 %v283_v28, 0.0 }
 0x12f   :  { %v289_v34 = vadd.f32 %v288_v33, %v1206_v10  ;;  %v382_v37 = vmax.f32 %v285_v30, 0.0 }
 0x130   :  { %v383_v36 = vmax.f32 %v287_v32, 0.0 }
 0x131   :  { %v384_v38 = vmax.f32 %v289_v34, 0.0 }
 0x132   :  { %v425_v39 = vpack.c.bf16 %v383_v36, %v381_v35 }
 0x133   :  { %v426_v40 = vpack.c.bf16 %v384_v38, %v382_v37  ;;  %v292_v41 = vpop.f32.mrb[44].mxu0 }
 0x134   :  { %v293_v42 = vadd.f32 %v292_v41, %v1204_v3  ;;  %v294_v43 = vpop.f32.mrb[45].mxu0 }
 0x135   :  { %v295_v44 = vadd.f32 %v294_v43, %v1206_v10  ;;  %v296_v45 = vpop.f32.mrb[46].mxu0  ;;  %684 = vmatprep.mubr.bf16.mxu1 %v426_v40 }
 0x136   :  { %v297_v46 = vadd.f32 %v296_v45, %v1204_v3  ;;  %v298_v47 = vpop.f32.mrb[47].mxu0  ;;  %685 = vmatmul.mubr.bf16.gmra.mrb[36].mxu1 %v425_v39  ;;  %v385_v49 = vmax.f32 %v293_v42, 0.0 }
 0x137   :  { %v299_v48 = vadd.f32 %v298_v47, %v1206_v10  ;;  %v386_v51 = vmax.f32 %v295_v44, 0.0 }
 0x138   :  { %v387_v50 = vmax.f32 %v297_v46, 0.0 }
 0x139   :  { %v388_v52 = vmax.f32 %v299_v48, 0.0 }
 0x13a   :  { %v427_v53 = vpack.c.bf16 %v387_v50, %v385_v49  ;;  %v1275_v50 = vld [vmem:[%s1325_s4] ss:$0 sm:$0xff]  ;;  %s989_s4 = smov [#allocation2]  }
 0x13b   :  { %v428_v54 = vpack.c.bf16 %v388_v52, %v386_v51  ;;  %v302_v55 = vpop.f32.mrb[48].mxu0  ;;  %s770_s13 = sshll.u32 %s989_s4, 4  ;;  %s771_s13 = int_to_ptr.vmem [resolvable:$true] %s770_s13 }
 0x13c   :  { %v303_v56 = vadd.f32 %v302_v55, %v1204_v3  ;;  %v304_v57 = vpop.f32.mrb[49].mxu0  ;;  %s964_s14 = scalar_lea.vmem %s771_s13, 4096  ;;  %p969_p1 = scmp.lt.s32.totalorder %s771_s13, %s771_s13 }
 0x13d   :  { %v305_v58 = vadd.f32 %v304_v57, %v1206_v10  ;;  %v306_v59 = vpop.f32.mrb[50].mxu0  ;;  %692 = vmatprep.mubr.bf16.mxu1 %v428_v54  ;;  %p965_p0 = scmp.ne.s32.totalorder %s771_s13, %s964_s14  ;;  %p970_p2 = scmp.lt.s32.totalorder %s964_s14, %s964_s14 }
 0x13e   :  { %v307_v60 = vadd.f32 %v306_v59, %v1204_v3  ;;  %v308_v61 = vpop.f32.mrb[51].mxu0  ;;  %693 = vmatmul.mubr.bf16.gmra.mrb[40].mxu1 %v427_v53  ;;  %v389_v63 = vmax.f32 %v303_v56, 0.0 }
 0x13f   :  { %v309_v62 = vadd.f32 %v308_v61, %v1206_v10  ;;  %v390_v1 = vmax.f32 %v305_v58, 0.0  ;;  %p971_p3 = por %p970_p2, %p969_p1 }
 0x140   :  { %v391_v0 = vmax.f32 %v307_v60, 0.0 }
 0x141   :  { %v392_v2 = vmax.f32 %v309_v62, 0.0  ;;  %p972_p4 = pnand %p971_p3, %p965_p0 }
 0x142   :  { %v429_v4 = vpack.c.bf16 %v391_v0, %v389_v63 }
 0x143   :  { %v430_v5 = vpack.c.bf16 %v392_v2, %v390_v1  ;;  %v312_v6 = vpop.f32.mrb[52].mxu0 }
 0x144   :  { %v313_v7 = vadd.f32 %v312_v6, %v1204_v3  ;;  %v314_v8 = vpop.f32.mrb[53].mxu0 }
 0x145   :  { %v315_v9 = vadd.f32 %v314_v8, %v1206_v10  ;;  %v316_v11 = vpop.f32.mrb[54].mxu0  ;;  %700 = vmatprep.mubr.bf16.mxu1 %v430_v5 }
 0x146   :  { %v317_v12 = vadd.f32 %v316_v11, %v1204_v3  ;;  %v318_v13 = vpop.f32.mrb[55].mxu0  ;;  %701 = vmatmul.mubr.bf16.gmra.mrb[44].mxu1 %v429_v4  ;;  %v393_v15 = vmax.f32 %v313_v7, 0.0 }
 0x147   :  { %v319_v14 = vadd.f32 %v318_v13, %v1206_v10  ;;  %v394_v17 = vmax.f32 %v315_v9, 0.0 }
 0x148   :  { %v395_v16 = vmax.f32 %v317_v12, 0.0 }
 0x149   :  { %v396_v18 = vmax.f32 %v319_v14, 0.0 }
 0x14a   :  { %v431_v19 = vpack.c.bf16 %v395_v16, %v393_v15 }
 0x14b   :  { %v432_v20 = vpack.c.bf16 %v396_v18, %v394_v17  ;;  %v322_v21 = vpop.f32.mrb[56].mxu0 }
 0x14c   :  { %v323_v22 = vadd.f32 %v322_v21, %v1204_v3  ;;  %v324_v23 = vpop.f32.mrb[57].mxu0 }
 0x14d   :  { %v325_v24 = vadd.f32 %v324_v23, %v1206_v10  ;;  %v326_v25 = vpop.f32.mrb[58].mxu0  ;;  %708 = vmatprep.mubr.bf16.mxu1 %v432_v20 }
 0x14e   :  { %v327_v26 = vadd.f32 %v326_v25, %v1204_v3  ;;  %v328_v27 = vpop.f32.mrb[59].mxu0  ;;  %709 = vmatmul.mubr.bf16.gmra.mrb[48].mxu1 %v431_v19  ;;  %v397_v29 = vmax.f32 %v323_v22, 0.0 }
 0x14f   :  { %v329_v28 = vadd.f32 %v328_v27, %v1206_v10  ;;  %v398_v31 = vmax.f32 %v325_v24, 0.0 }
 0x150   :  { %v399_v30 = vmax.f32 %v327_v26, 0.0 }
 0x151   :  { %v400_v32 = vmax.f32 %v329_v28, 0.0 }
 0x152   :  { %v433_v33 = vpack.c.bf16 %v399_v30, %v397_v29 }
 0x153   :  { %v434_v34 = vpack.c.bf16 %v400_v32, %v398_v31  ;;  %v332_v35 = vpop.f32.mrb[60].mxu0 }
 0x154   :  { %v333_v36 = vadd.f32 %v332_v35, %v1204_v3  ;;  %v334_v37 = vpop.f32.mrb[61].mxu0 }
 0x155   :  { %v335_v38 = vadd.f32 %v334_v37, %v1206_v10  ;;  %v336_v39 = vpop.f32.mrb[62].mxu0  ;;  %716 = vmatprep.mubr.bf16.mxu1 %v434_v34 }
 0x156   :  { %v337_v40 = vadd.f32 %v336_v39, %v1204_v3  ;;  %v338_v41 = vpop.f32.mrb[63].mxu0  ;;  %717 = vmatmul.mubr.bf16.gmra.mrb[52].mxu1 %v433_v33  ;;  %v401_v43 = vmax.f32 %v333_v36, 0.0 }
 0x157   :  { %v339_v42 = vadd.f32 %v338_v41, %v1206_v10  ;;  %v402_v45 = vmax.f32 %v335_v38, 0.0 }
 0x158   :  { %v403_v44 = vmax.f32 %v337_v40, 0.0 }
 0x159   :  { %v404_v46 = vmax.f32 %v339_v42, 0.0 }
 0x15a   :  { %v435_v47 = vpack.c.bf16 %v403_v44, %v401_v43 }
 0x15b   :  { %v436_v48 = vpack.c.bf16 %v404_v46, %v402_v45 }
 0x15d   :  { %724 = vmatprep.mubr.bf16.mxu1 %v436_v48 }
 0x15e   :  { %725 = vmatmul.mubr.bf16.gmra.mrb[56].mxu1 %v435_v47 }
 0x1b9   :  { %v832_v49 = vpop.f32.mrb[64].mxu0 }
 0x1ba   :  { %v833_v51 = vpop.f32.mrb[65].mxu0 }
 0x1bb   :  { %v834_v3 = vadd.f32 %v833_v51, %v832_v49  ;;  %v835_v52 = vpop.f32.mrb[66].mxu0 }
 0x1bc   :  { %v836_v53 = vpop.f32.mrb[67].mxu0 }
 0x1bd   :  { %v607_v10 = vadd.f32 %v834_v3, %v1275_v50  ;;  %v837_v54 = vadd.f32 %v836_v53, %v835_v52 }
 0x1bf   :  { %733 = vst [vmem:[#allocation2] sm:$0xff] %v607_v10  ;;  %v610_v55 = vadd.f32 %v837_v54, %v1275_v50 }
 0x1c1   :  { %734 = vst [vmem:[#allocation2 + $0x8] sm:$0xff] %v610_v55  ;;  %v838_v56 = vpop.f32.mrb[0].mxu1 }
 0x1c2   :  { %v839_v57 = vpop.f32.mrb[1].mxu1 }
 0x1c3   :  { %v840_v58 = vadd.f32 %v839_v57, %v838_v56  ;;  %v841_v59 = vpop.f32.mrb[2].mxu1 }
 0x1c4   :  { %v842_v60 = vpop.f32.mrb[3].mxu1 }
 0x1c5   :  { %v615_v61 = vadd.f32 %v840_v58, %v1275_v50  ;;  %v843_v62 = vadd.f32 %v842_v60, %v841_v59 }
 0x1c7   :  { %735 = vst [vmem:[#allocation2 + $0x10] sm:$0xff] %v615_v61  ;;  %v618_v63 = vadd.f32 %v843_v62, %v1275_v50 }
 0x1c9   :  { %736 = vst [vmem:[#allocation2 + $0x18] sm:$0xff] %v618_v63  ;;  %v844_v0 = vpop.f32.mrb[4].mxu1 }
 0x1ca   :  { %v845_v1 = vpop.f32.mrb[5].mxu1 }
 0x1cb   :  { %v846_v2 = vadd.f32 %v845_v1, %v844_v0  ;;  %v847_v4 = vpop.f32.mrb[6].mxu1 }
 0x1cc   :  { %v848_v5 = vpop.f32.mrb[7].mxu1 }
 0x1cd   :  { %v623_v6 = vadd.f32 %v846_v2, %v1275_v50  ;;  %v849_v7 = vadd.f32 %v848_v5, %v847_v4 }
 0x1cf   :  { %737 = vst [vmem:[#allocation2 + $0x20] sm:$0xff] %v623_v6  ;;  %v626_v8 = vadd.f32 %v849_v7, %v1275_v50 }
 0x1d1   :  { %738 = vst [vmem:[#allocation2 + $0x28] sm:$0xff] %v626_v8  ;;  %v850_v9 = vpop.f32.mrb[8].mxu1 }
 0x1d2   :  { %v851_v11 = vpop.f32.mrb[9].mxu1 }
 0x1d3   :  { %v852_v12 = vadd.f32 %v851_v11, %v850_v9  ;;  %v853_v13 = vpop.f32.mrb[10].mxu1 }
 0x1d4   :  { %v854_v14 = vpop.f32.mrb[11].mxu1 }
 0x1d5   :  { %v631_v15 = vadd.f32 %v852_v12, %v1275_v50  ;;  %v855_v16 = vadd.f32 %v854_v14, %v853_v13 }
 0x1d7   :  { %739 = vst [vmem:[#allocation2 + $0x30] sm:$0xff] %v631_v15  ;;  %v634_v17 = vadd.f32 %v855_v16, %v1275_v50 }
 0x1d9   :  { %740 = vst [vmem:[#allocation2 + $0x38] sm:$0xff] %v634_v17  ;;  %v856_v18 = vpop.f32.mrb[12].mxu1 }
 0x1da   :  { %v857_v19 = vpop.f32.mrb[13].mxu1 }
 0x1db   :  { %v858_v20 = vadd.f32 %v857_v19, %v856_v18  ;;  %v859_v21 = vpop.f32.mrb[14].mxu1 }
 0x1dc   :  { %v860_v22 = vpop.f32.mrb[15].mxu1 }
 0x1dd   :  { %v639_v23 = vadd.f32 %v858_v20, %v1275_v50  ;;  %v861_v24 = vadd.f32 %v860_v22, %v859_v21 }
 0x1df   :  { %741 = vst [vmem:[#allocation2 + $0x40] sm:$0xff] %v639_v23  ;;  %v642_v25 = vadd.f32 %v861_v24, %v1275_v50 }
 0x1e1   :  { %742 = vst [vmem:[#allocation2 + $0x48] sm:$0xff] %v642_v25  ;;  %v862_v26 = vpop.f32.mrb[16].mxu1 }
 0x1e2   :  { %v863_v27 = vpop.f32.mrb[17].mxu1 }
 0x1e3   :  { %v864_v28 = vadd.f32 %v863_v27, %v862_v26  ;;  %v865_v29 = vpop.f32.mrb[18].mxu1 }
 0x1e4   :  { %v866_v30 = vpop.f32.mrb[19].mxu1 }
 0x1e5   :  { %v647_v31 = vadd.f32 %v864_v28, %v1275_v50  ;;  %v867_v32 = vadd.f32 %v866_v30, %v865_v29 }
 0x1e7   :  { %743 = vst [vmem:[#allocation2 + $0x50] sm:$0xff] %v647_v31  ;;  %v650_v33 = vadd.f32 %v867_v32, %v1275_v50 }
 0x1e9   :  { %744 = vst [vmem:[#allocation2 + $0x58] sm:$0xff] %v650_v33  ;;  %v868_v34 = vpop.f32.mrb[20].mxu1 }
 0x1ea   :  { %v869_v35 = vpop.f32.mrb[21].mxu1 }
 0x1eb   :  { %v870_v36 = vadd.f32 %v869_v35, %v868_v34  ;;  %v871_v37 = vpop.f32.mrb[22].mxu1 }
 0x1ec   :  { %v872_v38 = vpop.f32.mrb[23].mxu1 }
 0x1ed   :  { %v655_v39 = vadd.f32 %v870_v36, %v1275_v50  ;;  %v873_v40 = vadd.f32 %v872_v38, %v871_v37 }
 0x1ef   :  { %745 = vst [vmem:[#allocation2 + $0x60] sm:$0xff] %v655_v39  ;;  %v658_v41 = vadd.f32 %v873_v40, %v1275_v50 }
 0x1f1   :  { %746 = vst [vmem:[#allocation2 + $0x68] sm:$0xff] %v658_v41  ;;  %v874_v42 = vpop.f32.mrb[24].mxu1 }
 0x1f2   :  { %v875_v43 = vpop.f32.mrb[25].mxu1 }
 0x1f3   :  { %v876_v44 = vadd.f32 %v875_v43, %v874_v42  ;;  %v877_v45 = vpop.f32.mrb[26].mxu1 }
 0x1f4   :  { %v878_v46 = vpop.f32.mrb[27].mxu1 }
 0x1f5   :  { %v663_v47 = vadd.f32 %v876_v44, %v1275_v50  ;;  %v879_v48 = vadd.f32 %v878_v46, %v877_v45 }
 0x1f7   :  { %747 = vst [vmem:[#allocation2 + $0x70] sm:$0xff] %v663_v47  ;;  %v666_v49 = vadd.f32 %v879_v48, %v1275_v50 }
 0x1f9   :  { %748 = vst [vmem:[#allocation2 + $0x78] sm:$0xff] %v666_v49  ;;  %v880_v51 = vpop.f32.mrb[28].mxu1 }
 0x1fa   :  { %v881_v3 = vpop.f32.mrb[29].mxu1 }
 0x1fb   :  { %v882_v52 = vadd.f32 %v881_v3, %v880_v51  ;;  %v883_v53 = vpop.f32.mrb[30].mxu1 }
 0x1fc   :  { %v884_v10 = vpop.f32.mrb[31].mxu1 }
 0x1fd   :  { %v671_v54 = vadd.f32 %v882_v52, %v1275_v50  ;;  %v885_v55 = vadd.f32 %v884_v10, %v883_v53 }
 0x1ff   :  { %749 = vst [vmem:[#allocation2 + $0x80] sm:$0xff] %v671_v54  ;;  %v674_v56 = vadd.f32 %v885_v55, %v1275_v50 }
 0x201   :  { %750 = vst [vmem:[#allocation2 + $0x88] sm:$0xff] %v674_v56  ;;  %v886_v57 = vpop.f32.mrb[32].mxu1 }
 0x202   :  { %v887_v58 = vpop.f32.mrb[33].mxu1 }
 0x203   :  { %v888_v59 = vadd.f32 %v887_v58, %v886_v57  ;;  %v889_v60 = vpop.f32.mrb[34].mxu1 }
 0x204   :  { %v890_v61 = vpop.f32.mrb[35].mxu1 }
 0x205   :  { %v679_v62 = vadd.f32 %v888_v59, %v1275_v50  ;;  %v891_v63 = vadd.f32 %v890_v61, %v889_v60 }
 0x207   :  { %751 = vst [vmem:[#allocation2 + $0x90] sm:$0xff] %v679_v62  ;;  %v682_v0 = vadd.f32 %v891_v63, %v1275_v50 }
 0x209   :  { %752 = vst [vmem:[#allocation2 + $0x98] sm:$0xff] %v682_v0  ;;  %v892_v1 = vpop.f32.mrb[36].mxu1 }
 0x20a   :  { %v893_v2 = vpop.f32.mrb[37].mxu1 }
 0x20b   :  { %v894_v4 = vadd.f32 %v893_v2, %v892_v1  ;;  %v895_v5 = vpop.f32.mrb[38].mxu1 }
 0x20c   :  { %v896_v6 = vpop.f32.mrb[39].mxu1 }
 0x20d   :  { %v687_v7 = vadd.f32 %v894_v4, %v1275_v50  ;;  %v897_v8 = vadd.f32 %v896_v6, %v895_v5 }
 0x20f   :  { %753 = vst [vmem:[#allocation2 + $0xa0] sm:$0xff] %v687_v7  ;;  %v690_v9 = vadd.f32 %v897_v8, %v1275_v50 }
 0x211   :  { %754 = vst [vmem:[#allocation2 + $0xa8] sm:$0xff] %v690_v9  ;;  %v898_v11 = vpop.f32.mrb[40].mxu1 }
 0x212   :  { %v899_v12 = vpop.f32.mrb[41].mxu1 }
 0x213   :  { %v900_v13 = vadd.f32 %v899_v12, %v898_v11  ;;  %v901_v14 = vpop.f32.mrb[42].mxu1 }
 0x214   :  { %v902_v15 = vpop.f32.mrb[43].mxu1 }
 0x215   :  { %v695_v16 = vadd.f32 %v900_v13, %v1275_v50  ;;  %v903_v17 = vadd.f32 %v902_v15, %v901_v14 }
 0x217   :  { %755 = vst [vmem:[#allocation2 + $0xb0] sm:$0xff] %v695_v16  ;;  %v698_v18 = vadd.f32 %v903_v17, %v1275_v50 }
 0x219   :  { %756 = vst [vmem:[#allocation2 + $0xb8] sm:$0xff] %v698_v18  ;;  %v904_v19 = vpop.f32.mrb[44].mxu1 }
 0x21a   :  { %v905_v20 = vpop.f32.mrb[45].mxu1 }
 0x21b   :  { %v906_v21 = vadd.f32 %v905_v20, %v904_v19  ;;  %v907_v22 = vpop.f32.mrb[46].mxu1 }
 0x21c   :  { %v908_v23 = vpop.f32.mrb[47].mxu1 }
 0x21d   :  { %v703_v24 = vadd.f32 %v906_v21, %v1275_v50  ;;  %v909_v25 = vadd.f32 %v908_v23, %v907_v22 }
 0x21f   :  { %757 = vst [vmem:[#allocation2 + $0xc0] sm:$0xff] %v703_v24  ;;  %v706_v26 = vadd.f32 %v909_v25, %v1275_v50 }
 0x221   :  { %758 = vst [vmem:[#allocation2 + $0xc8] sm:$0xff] %v706_v26  ;;  %v910_v27 = vpop.f32.mrb[48].mxu1 }
 0x222   :  { %v911_v28 = vpop.f32.mrb[49].mxu1 }
 0x223   :  { %v912_v29 = vadd.f32 %v911_v28, %v910_v27  ;;  %v913_v30 = vpop.f32.mrb[50].mxu1 }
 0x224   :  { %v914_v31 = vpop.f32.mrb[51].mxu1 }
 0x225   :  { %v711_v32 = vadd.f32 %v912_v29, %v1275_v50  ;;  %v915_v33 = vadd.f32 %v914_v31, %v913_v30 }
 0x227   :  { %759 = vst [vmem:[#allocation2 + $0xd0] sm:$0xff] %v711_v32  ;;  %v714_v34 = vadd.f32 %v915_v33, %v1275_v50 }
 0x229   :  { %760 = vst [vmem:[#allocation2 + $0xd8] sm:$0xff] %v714_v34  ;;  %v916_v35 = vpop.f32.mrb[52].mxu1 }
 0x22a   :  { %v917_v36 = vpop.f32.mrb[53].mxu1 }
 0x22b   :  { %v918_v37 = vadd.f32 %v917_v36, %v916_v35  ;;  %v919_v38 = vpop.f32.mrb[54].mxu1 }
 0x22c   :  { %v920_v39 = vpop.f32.mrb[55].mxu1 }
 0x22d   :  { %v719_v40 = vadd.f32 %v918_v37, %v1275_v50  ;;  %v921_v41 = vadd.f32 %v920_v39, %v919_v38 }
 0x22f   :  { %761 = vst [vmem:[#allocation2 + $0xe0] sm:$0xff] %v719_v40  ;;  %v722_v42 = vadd.f32 %v921_v41, %v1275_v50 }
 0x231   :  { %762 = vst [vmem:[#allocation2 + $0xe8] sm:$0xff] %v722_v42  ;;  %v922_v43 = vpop.f32.mrb[56].mxu1 }
 0x232   :  { %v923_v44 = vpop.f32.mrb[57].mxu1 }
 0x233   :  { %v924_v45 = vadd.f32 %v923_v44, %v922_v43  ;;  %v925_v46 = vpop.f32.mrb[58].mxu1 }
 0x234   :  { %v926_v47 = vpop.f32.mrb[59].mxu1 }
 0x235   :  { %v727_v48 = vadd.f32 %v924_v45, %v1275_v50  ;;  %v927_v49 = vadd.f32 %v926_v47, %v925_v46 }
 0x237   :  { %763 = vst [vmem:[#allocation2 + $0xf0] sm:$0xff] %v727_v48  ;;  %v730_v51 = vadd.f32 %v927_v49, %v1275_v50 }
 0x239   :  { %764 = vst [vmem:[#allocation2 + $0xf8] sm:$0xff] %v730_v51 }
 0x23a   :  { %975 = shalt.err (!%p972_p4)
}
 0x23b   :  { %s976_s17 = scalar_lea.hbm %s1326_s5, 4096 }
 0x23c   :  { %p977_p5 = scmp.ne.s32.totalorder %s1326_s5, %s976_s17  ;;  %p980_p6 = scmp.lt.u32.totalorder %s976_s17, %s1326_s5 }
 0x23e   :  { %p982_p7 = pnand %p980_p6, %p977_p5 }
 0x240   :  { %985 = shalt.err (!%p982_p7)
}
 0x241   :  { %s990_s22 = smov 128   ;;  %s991_s23 = smov 8  }
 0x242   :  { %776 = dma.vmem_to_hbm [thread:$0]  %s771_s13, 4096, %s1326_s5, [#allocation3], %s990_s22, %s990_s22, %s991_s23  }
 0x243   :  { %986 = dma.done.wait [#allocation3], 4096  }
 0x244   :  { %987 = vsyncadd [#allocation3], 4294963200 }
 0x245   :  { %780 = vsyncpa [#allocation3], 1 }

</bundles_post_ra>
